<compile_context>
chip_gen: v7x
topology: tpu7x:2x2x1
jax: 0.10.0
libtpu: 0.0.40
codegen_flags: <defaults>
</compile_context>

<pallas_src>
import functools

import jax
import jax.numpy as jnp
from jax.experimental import pallas as pl
from jax.experimental.pallas import tpu as pltpu

_N_DIGIT = 10
_N_PARITY = 2
_OUT_W = 16            # fused head output width: [digit(10) | parity(2) | pad(4)]
_HID = (128, 64, 32)   # trunk widths
_MIN_ROWS_PER_CORE = 512


def _mtl_kernel(x_ref,
                w1_ref, b1_ref,
                w2_ref, b2_ref,
                w3_ref, b3_ref,
                wh_ref, bh_ref,
                out_ref):
    """Whole forward pass for one batch tile.

    Matmul operands are cast in-kernel to the weight dtype (bf16 on the perf
    path); accumulation, bias add and ReLU stay f32 (VPU-safe on v5e too).
    """
    cdt = w1_ref.dtype  # compute dtype of matmul operands (bf16 or f32)

    h = jnp.dot(x_ref[...].astype(cdt), w1_ref[...],
                preferred_element_type=jnp.float32) + b1_ref[...]
    h = jnp.maximum(h, 0.0)
    h = jnp.dot(h.astype(cdt), w2_ref[...],
                preferred_element_type=jnp.float32) + b2_ref[...]
    h = jnp.maximum(h, 0.0)
    h = jnp.dot(h.astype(cdt), w3_ref[...],
                preferred_element_type=jnp.float32) + b3_ref[...]
    h = jnp.maximum(h, 0.0)

    # Fused heads: one (32, 16) zero-padded matmul, one narrow (tile, 16) store.
    # Columns [0:10] = digit logits, [10:12] = parity logits, rest = zeros.
    out_ref[...] = (jnp.dot(h.astype(cdt), wh_ref[...],
                            preferred_element_type=jnp.float32)
                    + bh_ref[...]).astype(out_ref.dtype)


def _full_spec(shape):
    # Whole-array block (constant index map) for weights / biases.
    return pl.BlockSpec(shape, lambda i: (0,) * len(shape))


def _choose_tile(B, batch_tile):
    """Single big step when the batch fits; only split when each half gets
    MXU-sized (>= _MIN_ROWS_PER_CORE) work so a v7x megacore split pays off
    while costing v5e/v6e (single TC) almost nothing."""
    batch_tile = max(8, -(-batch_tile // 8) * 8)
    if B > batch_tile:
        return batch_tile
    if B >= 2 * _MIN_ROWS_PER_CORE:
        return -(-(B // 2) // 8) * 8          # ceil(B/2) rounded up to mult of 8
    return B                                  # one grid step, no overhead


def prepare_params(params, *, use_bf16=True):
    """One-time, out-of-the-hot-loop parameter prep:
      * fuse the digit/parity heads into a single zero-padded (32, 16) matmul,
      * cast weight matrices to bf16 (biases stay f32).
    Returns a flat tuple consumed by multi_task_forward."""
    (w1, b1), (w2, b2), (w3, b3), (wd, bd), (wp, bp) = params

    wh = jnp.zeros((w3.shape[1], _OUT_W), jnp.float32)
    wh = wh.at[:, :_N_DIGIT].set(wd)
    wh = wh.at[:, _N_DIGIT:_N_DIGIT + _N_PARITY].set(wp)
    bh = jnp.zeros((1, _OUT_W), jnp.float32)
    bh = bh.at[:, :_N_DIGIT].set(bd)
    bh = bh.at[:, _N_DIGIT:_N_DIGIT + _N_PARITY].set(bp)

    cdt = jnp.bfloat16 if use_bf16 else jnp.float32
    return (w1.astype(cdt), b1, w2.astype(cdt), b2,
            w3.astype(cdt), b3, wh.astype(cdt), bh)


@functools.partial(jax.jit, static_argnames=("batch_tile",))
def multi_task_forward(x, prepared, *, batch_tile=2048):
    """x: [B, n_input] float32.  prepared: output of prepare_params."""
    B, n_input = x.shape
    w1, b1, w2, b2, w3, b3, wh, bh = prepared

    tile = _choose_tile(B, batch_tile)
    grid = (pl.cdiv(B, tile),)

    in_specs = [
        pl.BlockSpec((tile, n_input), lambda i: (i, 0)),   # x: tiled over batch
        _full_spec(w1.shape), _full_spec(b1.shape),
        _full_spec(w2.shape), _full_spec(b2.shape),
        _full_spec(w3.shape), _full_spec(b3.shape),
        _full_spec(wh.shape), _full_spec(bh.shape),
    ]
    out_specs = pl.BlockSpec((tile, _OUT_W), lambda i: (i, 0))
    out_shape = jax.ShapeDtypeStruct((B, _OUT_W), jnp.float32)

    w_itemsize = jnp.dtype(w1.dtype).itemsize
    w_elems = (n_input * _HID[0] + _HID[0] * _HID[1]
               + _HID[1] * _HID[2] + _HID[2] * _OUT_W)
    b_elems = _HID[0] + _HID[1] + _HID[2] + _OUT_W

    flops = 2 * B * w_elems
    bytes_accessed = (B * n_input * 4            # x (f32, cast in-kernel)
                      + B * _OUT_W * 4           # narrow fused output
                      + w_elems * w_itemsize     # weights
                      + b_elems * 4)             # biases

    # Per-step VMEM footprint (double-buffered x/out blocks + weights + biases).
    footprint = (2 * (tile * n_input * 4 + tile * _OUT_W * 4)
                 + 2 * (w_elems * w_itemsize + b_elems * 4))
    vmem_limit = None
    if footprint > 30 * 1024 * 1024:
        vmem_limit = min(int(footprint * 1.2), 48 * 1024 * 1024)  # v7x-safe cap

    out = pl.pallas_call(
        _mtl_kernel,
        grid=grid,
        in_specs=in_specs,
        out_specs=out_specs,
        out_shape=out_shape,
        cost_estimate=pl.CostEstimate(
            flops=flops, transcendentals=0, bytes_accessed=bytes_accessed),
        compiler_params=pltpu.CompilerParams(
            dimension_semantics=("parallel",),
            vmem_limit_bytes=vmem_limit),
    )(x, w1, b1, w2, b2, w3, b3, wh, bh)

    digit = out[:, :_N_DIGIT]
    parity = out[:, _N_DIGIT:_N_DIGIT + _N_PARITY]
    return digit, parity


def init_params(key, n_input):
    """Deterministic init mimicking nn.Linear default (uniform +/- 1/sqrt(fan_in)).

    Weights stored as (in, out); biases as (1, out) for clean broadcasting on TPU.
    """
    dims = [(n_input, _HID[0]), (_HID[0], _HID[1]), (_HID[1], _HID[2]),
            (_HID[2], _N_DIGIT), (_HID[2], _N_PARITY)]
    params = []
    for (fan_in, fan_out) in dims:
        key, kw, kb = jax.random.split(key, 3)
        bound = 1.0 / jnp.sqrt(fan_in)
        w = jax.random.uniform(kw, (fan_in, fan_out), jnp.float32, -bound, bound)
        b = jax.random.uniform(kb, (1, fan_out), jnp.float32, -bound, bound)
        params.append((w, b))
    return params


def reference_forward(x, params, *, use_bf16=False):
    (w1, b1), (w2, b2), (w3, b3), (wd, bd), (wp, bp) = params
    cdt = jnp.bfloat16 if use_bf16 else jnp.float32

    def lin(h, w, b):
        return jnp.dot(h.astype(cdt), w.astype(cdt),
                       preferred_element_type=jnp.float32) + b

    h = jnp.maximum(lin(x, w1, b1), 0.0)
    h = jnp.maximum(lin(h, w2, b2), 0.0)
    h = jnp.maximum(lin(h, w3, b3), 0.0)
    return lin(h, wd, bd), lin(h, wp, bp)


if __name__ == "__main__":
    key = jax.random.PRNGKey(0)
    k_x, k_p = jax.random.split(key)

    B, N_INPUT = 64, 64
    x = jax.random.normal(k_x, (B, N_INPUT), jnp.float32)
    params = init_params(k_p, N_INPUT)

    # Perf path: bf16 matmul operands (cast in-kernel / at prepare time),
    # f32 accumulation / bias / ReLU.
    prepared_bf16 = prepare_params(params, use_bf16=True)
    digit, parity = multi_task_forward(x, prepared_bf16)
    jax.block_until_ready((digit, parity))
    assert digit.shape == (B, _N_DIGIT) and parity.shape == (B, _N_PARITY)
    d_ref, p_ref = reference_forward(x, params, use_bf16=True)
    assert jnp.allclose(digit, d_ref, atol=1e-2, rtol=1e-2)
    assert jnp.allclose(parity, p_ref, atol=1e-2, rtol=1e-2)

    # Full-precision path matches the f32 reference tightly.
    prepared_f32 = prepare_params(params, use_bf16=False)
    digit32, parity32 = multi_task_forward(x, prepared_f32)
    jax.block_until_ready((digit32, parity32))
    d_ref32, p_ref32 = reference_forward(x, params, use_bf16=False)
    assert jnp.allclose(digit32, d_ref32, atol=1e-5, rtol=1e-5)
    assert jnp.allclose(parity32, p_ref32, atol=1e-5, rtol=1e-5)

    print("KERNEL_OK")
</pallas_src>

<mosaic_0001>
module attributes {stable_mosaic.version = 11 : i64} {
  func.func @_mtl_kernel(%arg0: i32, %arg1: memref<64x64xf32, #tpu.memory_space<vmem>>, %arg2: memref<64x128xbf16, #tpu.memory_space<vmem>>, %arg3: memref<1x128xf32, #tpu.memory_space<vmem>>, %arg4: memref<128x64xbf16, #tpu.memory_space<vmem>>, %arg5: memref<1x64xf32, #tpu.memory_space<vmem>>, %arg6: memref<64x32xbf16, #tpu.memory_space<vmem>>, %arg7: memref<1x32xf32, #tpu.memory_space<vmem>>, %arg8: memref<32x16xbf16, #tpu.memory_space<vmem>>, %arg9: memref<1x16xf32, #tpu.memory_space<vmem>>, %arg10: memref<64x16xf32, #tpu.memory_space<vmem>>) attributes {dimension_semantics = [#tpu.dimension_semantics<parallel>], iteration_bounds = array<i64: 1>, scalar_prefetch = 0 : i64, scratch_operands = 0 : i64, tpu.core_type = #tpu.core_type<tc>, window_params = [{transform_indices = @transform_0, window_bounds = array<i64: 64, 64>}, {pipeline_mode = #tpu.pipeline_mode<synchronous>, transform_indices = @transform_1, window_bounds = array<i64: 64, 128>}, {pipeline_mode = #tpu.pipeline_mode<synchronous>, transform_indices = @transform_2, window_bounds = array<i64: 1, 128>}, {pipeline_mode = #tpu.pipeline_mode<synchronous>, transform_indices = @transform_3, window_bounds = array<i64: 128, 64>}, {pipeline_mode = #tpu.pipeline_mode<synchronous>, transform_indices = @transform_4, window_bounds = array<i64: 1, 64>}, {pipeline_mode = #tpu.pipeline_mode<synchronous>, transform_indices = @transform_5, window_bounds = array<i64: 64, 32>}, {pipeline_mode = #tpu.pipeline_mode<synchronous>, transform_indices = @transform_6, window_bounds = array<i64: 1, 32>}, {pipeline_mode = #tpu.pipeline_mode<synchronous>, transform_indices = @transform_7, window_bounds = array<i64: 32, 16>}, {pipeline_mode = #tpu.pipeline_mode<synchronous>, transform_indices = @transform_8, window_bounds = array<i64: 1, 16>}, {transform_indices = @transform_9, window_bounds = array<i64: 64, 16>}]} {
    %c0 = arith.constant 0 : index
    %c0_0 = arith.constant 0 : index
    %0 = vector.load %arg1[%c0, %c0_0] : memref<64x64xf32, #tpu.memory_space<vmem>>, vector<64x64xf32>
    %1 = arith.truncf %0 : vector<64x64xf32> to vector<64x64xbf16>
    %c0_1 = arith.constant 0 : index
    %c0_2 = arith.constant 0 : index
    %2 = vector.load %arg2[%c0_1, %c0_2] : memref<64x128xbf16, #tpu.memory_space<vmem>>, vector<64x128xbf16>
    %cst = arith.constant dense<0.000000e+00> : vector<64x128xf32>
    %3 = tpu.matmul %1, %2, %cst {dimension_numbers = #tpu.dot_dimension_numbers<[1], [0], [0], [1], [0, 0, 1, 1], [], []>} : vector<64x64xbf16>, vector<64x128xbf16>, vector<64x128xf32> -> vector<64x128xf32>
    %c0_3 = arith.constant 0 : index
    %c0_4 = arith.constant 0 : index
    %4 = vector.load %arg3[%c0_3, %c0_4] : memref<1x128xf32, #tpu.memory_space<vmem>>, vector<1x128xf32>
    %5 = vector.broadcast %4 : vector<1x128xf32> to vector<64x128xf32>
    %6 = arith.addf %3, %5 : vector<64x128xf32>
    %cst_5 = arith.constant 0.000000e+00 : f32
    %7 = vector.broadcast %cst_5 : f32 to vector<64x128xf32>
    %8 = arith.maximumf %6, %7 : vector<64x128xf32>
    %9 = arith.truncf %8 : vector<64x128xf32> to vector<64x128xbf16>
    %c0_6 = arith.constant 0 : index
    %c0_7 = arith.constant 0 : index
    %10 = vector.load %arg4[%c0_6, %c0_7] : memref<128x64xbf16, #tpu.memory_space<vmem>>, vector<128x64xbf16>
    %cst_8 = arith.constant dense<0.000000e+00> : vector<64x64xf32>
    %11 = tpu.matmul %9, %10, %cst_8 {dimension_numbers = #tpu.dot_dimension_numbers<[1], [0], [0], [1], [0, 0, 1, 1], [], []>} : vector<64x128xbf16>, vector<128x64xbf16>, vector<64x64xf32> -> vector<64x64xf32>
    %c0_9 = arith.constant 0 : index
    %c0_10 = arith.constant 0 : index
    %12 = vector.load %arg5[%c0_9, %c0_10] : memref<1x64xf32, #tpu.memory_space<vmem>>, vector<1x64xf32>
    %13 = vector.broadcast %12 : vector<1x64xf32> to vector<64x64xf32>
    %14 = arith.addf %11, %13 : vector<64x64xf32>
    %cst_11 = arith.constant 0.000000e+00 : f32
    %15 = vector.broadcast %cst_11 : f32 to vector<64x64xf32>
    %16 = arith.maximumf %14, %15 : vector<64x64xf32>
    %17 = arith.truncf %16 : vector<64x64xf32> to vector<64x64xbf16>
    %c0_12 = arith.constant 0 : index
    %c0_13 = arith.constant 0 : index
    %18 = vector.load %arg6[%c0_12, %c0_13] : memref<64x32xbf16, #tpu.memory_space<vmem>>, vector<64x32xbf16>
    %cst_14 = arith.constant dense<0.000000e+00> : vector<64x32xf32>
    %19 = tpu.matmul %17, %18, %cst_14 {dimension_numbers = #tpu.dot_dimension_numbers<[1], [0], [0], [1], [0, 0, 1, 1], [], []>} : vector<64x64xbf16>, vector<64x32xbf16>, vector<64x32xf32> -> vector<64x32xf32>
    %c0_15 = arith.constant 0 : index
    %c0_16 = arith.constant 0 : index
    %20 = vector.load %arg7[%c0_15, %c0_16] : memref<1x32xf32, #tpu.memory_space<vmem>>, vector<1x32xf32>
    %21 = vector.broadcast %20 : vector<1x32xf32> to vector<64x32xf32>
    %22 = arith.addf %19, %21 : vector<64x32xf32>
    %cst_17 = arith.constant 0.000000e+00 : f32
    %23 = vector.broadcast %cst_17 : f32 to vector<64x32xf32>
    %24 = arith.maximumf %22, %23 : vector<64x32xf32>
    %25 = arith.truncf %24 : vector<64x32xf32> to vector<64x32xbf16>
    %c0_18 = arith.constant 0 : index
    %c0_19 = arith.constant 0 : index
    %26 = vector.load %arg8[%c0_18, %c0_19] : memref<32x16xbf16, #tpu.memory_space<vmem>>, vector<32x16xbf16>
    %cst_20 = arith.constant dense<0.000000e+00> : vector<64x16xf32>
    %27 = tpu.matmul %25, %26, %cst_20 {dimension_numbers = #tpu.dot_dimension_numbers<[1], [0], [0], [1], [0, 0, 1, 1], [], []>} : vector<64x32xbf16>, vector<32x16xbf16>, vector<64x16xf32> -> vector<64x16xf32>
    %c0_21 = arith.constant 0 : index
    %c0_22 = arith.constant 0 : index
    %28 = vector.load %arg9[%c0_21, %c0_22] : memref<1x16xf32, #tpu.memory_space<vmem>>, vector<1x16xf32>
    %29 = vector.broadcast %28 : vector<1x16xf32> to vector<64x16xf32>
    %30 = arith.addf %27, %29 : vector<64x16xf32>
    %c0_23 = arith.constant 0 : index
    %c0_24 = arith.constant 0 : index
    %31 = vector.load %arg10[%c0_23, %c0_24] : memref<64x16xf32, #tpu.memory_space<vmem>>, vector<64x16xf32>
    tpu.vector_store %arg10[%c0_23, %c0_24], %30 {strides = array<i32>} : memref<64x16xf32, #tpu.memory_space<vmem>>, vector<64x16xf32>,
    return
  }
  func.func @transform_0(%arg0: i32) -> (i32, i32) {
    %c0_i32 = arith.constant 0 : i32
    %c0_i32_0 = arith.constant 0 : i32
    return %arg0, %c0_i32 : i32, i32
  }
  func.func @transform_1(%arg0: i32) -> (i32, i32) {
    %c0_i32 = arith.constant 0 : i32
    %c0_i32_0 = arith.constant 0 : i32
    %c0_i32_1 = arith.constant 0 : i32
    return %c0_i32, %c0_i32_0 : i32, i32
  }
  func.func @transform_2(%arg0: i32) -> (i32, i32) {
    %c0_i32 = arith.constant 0 : i32
    %c0_i32_0 = arith.constant 0 : i32
    %c0_i32_1 = arith.constant 0 : i32
    return %c0_i32, %c0_i32_0 : i32, i32
  }
  func.func @transform_3(%arg0: i32) -> (i32, i32) {
    %c0_i32 = arith.constant 0 : i32
    %c0_i32_0 = arith.constant 0 : i32
    %c0_i32_1 = arith.constant 0 : i32
    return %c0_i32, %c0_i32_0 : i32, i32
  }
  func.func @transform_4(%arg0: i32) -> (i32, i32) {
    %c0_i32 = arith.constant 0 : i32
    %c0_i32_0 = arith.constant 0 : i32
    %c0_i32_1 = arith.constant 0 : i32
    return %c0_i32, %c0_i32_0 : i32, i32
  }
  func.func @transform_5(%arg0: i32) -> (i32, i32) {
    %c0_i32 = arith.constant 0 : i32
    %c0_i32_0 = arith.constant 0 : i32
    %c0_i32_1 = arith.constant 0 : i32
    return %c0_i32, %c0_i32_0 : i32, i32
  }
  func.func @transform_6(%arg0: i32) -> (i32, i32) {
    %c0_i32 = arith.constant 0 : i32
    %c0_i32_0 = arith.constant 0 : i32
    %c0_i32_1 = arith.constant 0 : i32
    return %c0_i32, %c0_i32_0 : i32, i32
  }
  func.func @transform_7(%arg0: i32) -> (i32, i32) {
    %c0_i32 = arith.constant 0 : i32
    %c0_i32_0 = arith.constant 0 : i32
    %c0_i32_1 = arith.constant 0 : i32
    return %c0_i32, %c0_i32_0 : i32, i32
  }
  func.func @transform_8(%arg0: i32) -> (i32, i32) {
    %c0_i32 = arith.constant 0 : i32
    %c0_i32_0 = arith.constant 0 : i32
    %c0_i32_1 = arith.constant 0 : i32
    return %c0_i32, %c0_i32_0 : i32, i32
  }
  func.func @transform_9(%arg0: i32) -> (i32, i32) {
    %c0_i32 = arith.constant 0 : i32
    %c0_i32_0 = arith.constant 0 : i32
    return %arg0, %c0_i32 : i32, i32
  }
}

</mosaic_0001>

<bundles_post_ra>
// kernel: multi_task_forward.1
= control target key start
LH: loop header
LB: loop body
LE: loop exit
PB: predicated region body
PF: predicated region fallthrough
CT: control target
= control target key end

     0   :  { %vm84_vm0 = vcmask 523264   ;;  %vm473_vm1 = vcmask 261120   ;;  %vm551_vm2 = vcmask 130048   ;;  %s910_s1 = inlined_call_operand.vmem [shape: bf16[64,128], index: 1, kind: input, shape index: {}]   ;;  %s911_s0 = inlined_call_operand.vmem [shape: f32[64,64], index: 0, kind: input, shape index: {}]   ;;  %s912_s3 = inlined_call_operand.vmem [shape: bf16[128,64], index: 3, kind: input, shape index: {}]   ;;  %s913_s5 = inlined_call_operand.vmem [shape: bf16[64,32], index: 5, kind: input, shape index: {}]   ;;  %s914_s2 = inlined_call_operand.vmem [shape: f32[1,128], index: 2, kind: input, shape index: {}]   ;;  %s915_s4 = inlined_call_operand.vmem [shape: f32[1,64], index: 4, kind: input, shape index: {}]   ;;  %s916_s7 = inlined_call_operand.vmem [shape: bf16[32,16], index: 7, kind: input, shape index: {}]   ;;  %s917_s6 = inlined_call_operand.vmem [shape: f32[1,32], index: 6, kind: input, shape index: {}]   ;;  %s918_s8 = inlined_call_operand.vmem [shape: f32[1,16], index: 8, kind: input, shape index: {}]   ;;  %s919_s9 = inlined_call_operand.vmem [shape: f32[64,16], index: 9, kind: output, shape index: {}]  }
   0x1   :  { %v708_v0 = vld [vmem:[%s910_s1] sm:$0xff]   ;;  %v709_v1 = vld [vmem:[%s910_s1 + $0x8] sm:$0xff]   ;;  %v710_v2 = vld [vmem:[%s910_s1 + $0x10] sm:$0xff]  }
   0x2   :  { %632 = vmatprep.subr.bf16.mxu0 %v708_v0  ;;  %v33_v3 = vld [vmem:[%s911_s0] sm:$0xff]  ;;  %v34_v4 = vld [vmem:[%s911_s0 + $0x8] sm:$0xff]  ;;  %v711_v6 = vld [vmem:[%s910_s1 + $0x18] sm:$0xff]  }
   0x3   :  { %633 = vmatpush3.bf16.msra.mxu0 %v708_v0  ;;  %v41_v5 = vpack.c.bf16 %v34_v4, %v33_v3  ;;  %v712_v7 = vld [vmem:[%s912_s3] sm:$0xff]   ;;  %v713_v8 = vld [vmem:[%s912_s3 + $0x8] sm:$0xff]   ;;  %v35_v9 = vld [vmem:[%s911_s0 + $0x10] sm:$0xff] }
   0x4   :  { %634 = vmatprep.subr.bf16.mxu0 %v709_v1  ;;  %v36_v10 = vld [vmem:[%s911_s0 + $0x18] sm:$0xff]  ;;  %648 = vmatprep.subr.bf16.mxu1 %v712_v7  ;;  %v37_v11 = vld [vmem:[%s911_s0 + $0x20] sm:$0xff]  ;;  %v714_v12 = vld [vmem:[%s912_s3 + $0x10] sm:$0xff]  }
   0x5   :  { %640 = vmatprep.mubr.msk.bf16.mxu0 %vm84_vm0, %v41_v5  ;;  %649 = vmatpush3.bf16.msra.mxu1 %v712_v7  ;;  %v38_v13 = vld [vmem:[%s911_s0 + $0x28] sm:$0xff]  ;;  %v42_v14 = vpack.c.bf16 %v36_v10, %v35_v9  ;;  %v715_v16 = vld [vmem:[%s912_s3 + $0x18] sm:$0xff]   ;;  %v39_v17 = vld [vmem:[%s911_s0 + $0x30] sm:$0xff] }
   0x6   :  { %650 = vmatprep.subr.bf16.mxu1 %v713_v8  ;;  %v43_v15 = vpack.c.bf16 %v38_v13, %v37_v11  ;;  %v40_v18 = vld [vmem:[%s911_s0 + $0x38] sm:$0xff]  ;;  %v716_v19 = vld [vmem:[%s912_s3 + $0x20] sm:$0xff]   ;;  %v717_v21 = vld [vmem:[%s912_s3 + $0x28] sm:$0xff]  }
   0x7   :  { %635 = vmatpush3.bf16.msra.mxu0 %v709_v1  ;;  %v44_v20 = vpack.c.bf16 %v40_v18, %v39_v17  ;;  %v718_v22 = vld [vmem:[%s912_s3 + $0x30] sm:$0xff]   ;;  %v719_v23 = vld [vmem:[%s912_s3 + $0x38] sm:$0xff]   ;;  %v720_v24 = vld [vmem:[%s913_s5] sm:$0xff]  }
   0x8   :  { %636 = vmatprep.subr.bf16.mxu0 %v710_v2  ;;  %v721_v25 = vld [vmem:[%s913_s5 + $0x8] sm:$0xff]   ;;  %v564_v26 = vld [vmem:[%s914_s2] ss:$0 sm:$0xff]  ;;  %v722_v55 = vld [vmem:[%s913_s5 + $0x10] sm:$0xff]  }
   0x9   :  { %651 = vmatpush3.bf16.msra.mxu1 %v713_v8  ;;  %v723_v56 = vld [vmem:[%s913_s5 + $0x18] sm:$0xff]   ;;  %v573_v57 = vld [vmem:[%s915_s4] ss:$0 sm:$0xff] }
   0xa   :  { %652 = vmatprep.subr.bf16.mxu1 %v714_v12 }
   0xb   :  { %637 = vmatpush3.bf16.msra.mxu0 %v710_v2 }
   0xc   :  { %638 = vmatprep.subr.bf16.mxu0 %v711_v6 }
   0xd   :  { %653 = vmatpush3.bf16.msra.mxu1 %v714_v12 }
   0xe   :  { %654 = vmatprep.subr.bf16.mxu1 %v715_v16 }
   0xf   :  { %639 = vmatpush3.bf16.msra.mxu0 %v711_v6 }
  0x10   :  { %672 = vmatprep.subr.bf16.mxu0 %v720_v24 }
  0x11   :  { %655 = vmatpush3.bf16.msra.mxu1 %v715_v16 }
  0x12   :  { %641 = vmatmul.mubr.msk.bf16.vlgmr.msra.gmra.mrb[0].mxu0 %vm84_vm0, %v42_v14  ;;  %656 = vmatprep.subr.bf16.mxu1 %v716_v19 }
  0x13   :  { %644 = vmatprep.mubr.msk.bf16.mxu0 %vm84_vm0, %v43_v15  ;;  %673 = vmatpush3.bf16.msra.mxu0 %v720_v24 }
  0x14   :  { %674 = vmatprep.subr.bf16.mxu0 %v721_v25 }
  0x15   :  { %657 = vmatpush3.bf16.msra.mxu1 %v716_v19 }
  0x16   :  { %658 = vmatprep.subr.bf16.mxu1 %v717_v21 }
  0x17   :  { %675 = vmatpush3.bf16.msra.mxu0 %v721_v25 }
  0x18   :  { %676 = vmatprep.subr.bf16.mxu0 %v722_v55 }
  0x19   :  { %659 = vmatpush3.bf16.msra.mxu1 %v717_v21 }
  0x1a   :  { %645 = vmatmul.mubr.msk.bf16.gmra.mrb[4].mxu0 %vm84_vm0, %v44_v20  ;;  %660 = vmatprep.subr.bf16.mxu1 %v718_v22 }
  0x1b   :  { %677 = vmatpush3.bf16.msra.mxu0 %v722_v55 }
  0x1c   :  { %678 = vmatprep.subr.bf16.mxu0 %v723_v56 }
  0x1d   :  { %661 = vmatpush3.bf16.msra.mxu1 %v718_v22  ;;  %v724_v22 = vld [vmem:[%s916_s7] sm:$0xff]  }
  0x1e   :  { %662 = vmatprep.subr.bf16.mxu1 %v719_v23 }
  0x1f   :  { %679 = vmatpush3.bf16.msra.mxu0 %v723_v56 }
  0x20   :  { %688 = vmatprep.subr.bf16.mxu0 %v724_v22 }
  0x21   :  { %663 = vmatpush3.bf16.msra.mxu1 %v719_v23  ;;  %v725_v23 = vld [vmem:[%s916_s7 + $0x8] sm:$0xff]  }
  0x22   :  { %700 = vmatprep.subr.bf16.mxu1 %v720_v24 }
  0xe5   :  { %v642_v27 = vpop.f32.mrb[0].mxu0 }
  0xe6   :  { %v140_v28 = vadd.f32 %v642_v27, %v564_v26  ;;  %v131_v29 = vpop.f32.mrb[1].mxu0 }
  0xe7   :  { %v132_v30 = vadd.f32 %v564_v26, %v131_v29  ;;  %v643_v31 = vpop.f32.mrb[2].mxu0 }
  0xe8   :  { %v143_v32 = vadd.f32 %v643_v31, %v564_v26  ;;  %v134_v33 = vpop.f32.mrb[3].mxu0  ;;  %v164_v35 = vmax.f32 %v140_v28, 0.0 }
  0xe9   :  { %v135_v34 = vadd.f32 %v564_v26, %v134_v33  ;;  %v162_v37 = vmax.f32 %v132_v30, 0.0 }
  0xea   :  { %v165_v36 = vmax.f32 %v143_v32, 0.0 }
  0xeb   :  { %v163_v38 = vmax.f32 %v135_v34, 0.0 }
  0xec   :  { %v171_v39 = vpack.c.bf16 %v165_v36, %v164_v35 }
  0xed   :  { %v646_v40 = vpop.f32.mrb[4].mxu0  ;;  %v170_v41 = vpack.c.bf16 %v163_v38, %v162_v37 }
  0xee   :  { %v156_v42 = vadd.f32 %v646_v40, %v564_v26  ;;  %v147_v43 = vpop.f32.mrb[5].mxu0 }
  0xef   :  { %v148_v44 = vadd.f32 %v564_v26, %v147_v43  ;;  %v647_v45 = vpop.f32.mrb[6].mxu0  ;;  %664 = vmatprep.mubr.bf16.mxu1 %v170_v41 }
  0xf0   :  { %v159_v46 = vadd.f32 %v647_v45, %v564_v26  ;;  %v150_v47 = vpop.f32.mrb[7].mxu0  ;;  %665 = vmatmul.mubr.bf16.vlgmr.msra.gmra.mrb[0].mxu1 %v171_v39  ;;  %v168_v49 = vmax.f32 %v156_v42, 0.0 }
  0xf1   :  { %v151_v48 = vadd.f32 %v564_v26, %v150_v47  ;;  %704 = vmatpush3.bf16.msra.mxu1 %v720_v24  ;;  %v166_v51 = vmax.f32 %v148_v44, 0.0  ;;  %v582_v24 = vld [vmem:[%s917_s6] ss:$0 sm:$0xff] }
  0xf2   :  { %v169_v50 = vmax.f32 %v159_v46, 0.0  ;;  %701 = vmatprep.subr.bf16.mxu1 %v721_v25 }
  0xf3   :  { %v167_v52 = vmax.f32 %v151_v48, 0.0 }
  0xf4   :  { %v173_v53 = vpack.c.bf16 %v169_v50, %v168_v49 }
  0xf5   :  { %v172_v54 = vpack.c.bf16 %v167_v52, %v166_v51  ;;  %705 = vmatpush3.bf16.msra.mxu1 %v721_v25 }
  0xf6   :  { %702 = vmatprep.subr.bf16.mxu1 %v722_v55 }
  0xf7   :  { %668 = vmatprep.mubr.bf16.mxu1 %v172_v54 }
  0xf8   :  { %669 = vmatmul.mubr.bf16.gmra.mrb[4].mxu1 %v173_v53  ;;  %v591_v53 = vld [vmem:[%s918_s8] ss:$0 sm:$0xff] }
  0xf9   :  { %706 = vmatpush3.bf16.msra.mxu1 %v722_v55 }
  0xfa   :  { %703 = vmatprep.subr.bf16.mxu1 %v723_v56 }
  0xfd   :  { %707 = vmatpush3.bf16.msra.mxu1 %v723_v56 }
 0x1c3   :  { %v666_v58 = vpop.f32.mrb[0].mxu1 }
 0x1c4   :  { %v288_v59 = vadd.f32 %v666_v58, %v573_v57  ;;  %v279_v60 = vpop.f32.mrb[1].mxu1 }
 0x1c5   :  { %v280_v61 = vadd.f32 %v573_v57, %v279_v60  ;;  %v667_v62 = vpop.f32.mrb[2].mxu1 }
 0x1c6   :  { %v291_v63 = vadd.f32 %v667_v62, %v573_v57  ;;  %v282_v0 = vpop.f32.mrb[3].mxu1  ;;  %v312_v2 = vmax.f32 %v288_v59, 0.0 }
 0x1c7   :  { %v283_v1 = vadd.f32 %v573_v57, %v282_v0  ;;  %v310_v4 = vmax.f32 %v280_v61, 0.0 }
 0x1c8   :  { %v313_v3 = vmax.f32 %v291_v63, 0.0 }
 0x1c9   :  { %v311_v5 = vmax.f32 %v283_v1, 0.0 }
 0x1ca   :  { %v319_v6 = vpack.c.bf16 %v313_v3, %v312_v2 }
 0x1cb   :  { %v318_v7 = vpack.c.bf16 %v311_v5, %v310_v4  ;;  %v670_v8 = vpop.f32.mrb[4].mxu1 }
 0x1cc   :  { %v304_v9 = vadd.f32 %v670_v8, %v573_v57  ;;  %v295_v10 = vpop.f32.mrb[5].mxu1 }
 0x1cd   :  { %v296_v11 = vadd.f32 %v573_v57, %v295_v10  ;;  %v671_v12 = vpop.f32.mrb[6].mxu1  ;;  %680 = vmatprep.mubr.msk.bf16.mxu0 %vm84_vm0, %v318_v7 }
 0x1ce   :  { %v307_v13 = vadd.f32 %v671_v12, %v573_v57  ;;  %v298_v14 = vpop.f32.mrb[7].mxu1  ;;  %681 = vmatmul.mubr.msk.bf16.vlgmr.msra.gmra.mrb[8].mxu0 %vm84_vm0, %v319_v6  ;;  %v316_v16 = vmax.f32 %v304_v9, 0.0 }
 0x1cf   :  { %v299_v15 = vadd.f32 %v573_v57, %v298_v14  ;;  %v314_v18 = vmax.f32 %v296_v11, 0.0  ;;  %689 = vmatpush3.bf16.msra.mxu0 %v724_v22 }
 0x1d0   :  { %v317_v17 = vmax.f32 %v307_v13, 0.0  ;;  %690 = vmatprep.subr.bf16.mxu0 %v725_v23 }
 0x1d1   :  { %v315_v19 = vmax.f32 %v299_v15, 0.0 }
 0x1d2   :  { %v321_v20 = vpack.c.bf16 %v317_v17, %v316_v16 }
 0x1d3   :  { %v320_v21 = vpack.c.bf16 %v315_v19, %v314_v18  ;;  %691 = vmatpush3.bf16.msra.mxu0 %v725_v23 }
 0x1d5   :  { %684 = vmatprep.mubr.msk.bf16.mxu1 %vm84_vm0, %v320_v21 }
 0x1d6   :  { %685 = vmatmul.mubr.msk.bf16.vlgmr.msra.gmra.mrb[8].mxu1 %vm84_vm0, %v321_v20 }
 0x2a1   :  { %v682_v25 = vpop.f32.mrb[8].mxu0 }
 0x2a2   :  { %v416_v26 = vadd.f32 %v682_v25, %v582_v24  ;;  %v407_v27 = vpop.f32.mrb[9].mxu0 }
 0x2a3   :  { %v408_v28 = vadd.f32 %v582_v24, %v407_v27  ;;  %v683_v29 = vpop.f32.mrb[10].mxu0 }
 0x2a4   :  { %v419_v30 = vadd.f32 %v683_v29, %v582_v24  ;;  %v410_v31 = vpop.f32.mrb[11].mxu0  ;;  %v440_v33 = vmax.f32 %v416_v26, 0.0 }
 0x2a5   :  { %v411_v32 = vadd.f32 %v582_v24, %v410_v31  ;;  %v438_v35 = vmax.f32 %v408_v28, 0.0 }
 0x2a6   :  { %v441_v34 = vmax.f32 %v419_v30, 0.0 }
 0x2a7   :  { %v439_v36 = vmax.f32 %v411_v32, 0.0 }
 0x2a8   :  { %v447_v37 = vpack.c.bf16 %v441_v34, %v440_v33 }
 0x2a9   :  { %v446_v38 = vpack.c.bf16 %v439_v36, %v438_v35  ;;  %v686_v39 = vpop.f32.mrb[8].mxu1 }
 0x2aa   :  { %v432_v40 = vadd.f32 %v686_v39, %v582_v24  ;;  %v423_v41 = vpop.f32.mrb[9].mxu1 }
 0x2ab   :  { %v424_v42 = vadd.f32 %v582_v24, %v423_v41  ;;  %v687_v43 = vpop.f32.mrb[10].mxu1  ;;  %692 = vmatprep.mubr.msk.bf16.mxu0 %vm473_vm1, %v446_v38 }
 0x2ac   :  { %v435_v44 = vadd.f32 %v687_v43, %v582_v24  ;;  %v426_v45 = vpop.f32.mrb[11].mxu1  ;;  %693 = vmatmul.mubr.msk.bf16.vlgmr.msra.gmra.mrb[12].mxu0 %vm473_vm1, %v447_v37  ;;  %v444_v47 = vmax.f32 %v432_v40, 0.0 }
 0x2ad   :  { %v427_v46 = vadd.f32 %v582_v24, %v426_v45  ;;  %v442_v49 = vmax.f32 %v424_v42, 0.0 }
 0x2ae   :  { %v445_v48 = vmax.f32 %v435_v44, 0.0 }
 0x2af   :  { %v443_v50 = vmax.f32 %v427_v46, 0.0 }
 0x2b0   :  { %v449_v51 = vpack.c.bf16 %v445_v48, %v444_v47 }
 0x2b1   :  { %v448_v52 = vpack.c.bf16 %v443_v50, %v442_v49 }
 0x2b3   :  { %696 = vmatprep.mubr.msk.bf16.mxu0 %vm473_vm1, %v448_v52 }
 0x2b4   :  { %697 = vmatmul.mubr.msk.bf16.gmra.mrb[16].mxu0 %vm473_vm1, %v449_v51 }
 0x37f   :  { %v694_v54 = vpop.f32.mrb[12].mxu0 }
 0x380   :  { %v529_v55 = vadd.f32 %v694_v54, %v591_v53  ;;  %v520_v56 = vpop.f32.mrb[13].mxu0 }
 0x381   :  { %v521_v57 = vadd.f32 %v591_v53, %v520_v56  ;;  %v695_v58 = vpop.f32.mrb[14].mxu0 }
 0x382   :  { %554 = vst.msk [vmem:[%s919_s9 + $0x10] sm:$0xff] %vm551_vm2, %v529_v55  ;;  %v532_v59 = vadd.f32 %v695_v58, %v591_v53  ;;  %v523_v60 = vpop.f32.mrb[15].mxu0 }
 0x383   :  { %552 = vst.msk [vmem:[%s919_s9] sm:$0xff] %vm551_vm2, %v521_v57  ;;  %v524_v61 = vadd.f32 %v591_v53, %v523_v60 }
 0x384   :  { %555 = vst.msk [vmem:[%s919_s9 + $0x18] sm:$0xff] %vm551_vm2, %v532_v59 }
 0x385   :  { %553 = vst.msk [vmem:[%s919_s9 + $0x8] sm:$0xff] %vm551_vm2, %v524_v61 }
 0x387   :  { %v698_v62 = vpop.f32.mrb[16].mxu0 }
 0x388   :  { %v545_v63 = vadd.f32 %v698_v62, %v591_v53  ;;  %v536_v0 = vpop.f32.mrb[17].mxu0 }
 0x389   :  { %v537_v1 = vadd.f32 %v591_v53, %v536_v0  ;;  %v699_v2 = vpop.f32.mrb[18].mxu0 }
 0x38a   :  { %558 = vst.msk [vmem:[%s919_s9 + $0x30] sm:$0xff] %vm551_vm2, %v545_v63  ;;  %v548_v3 = vadd.f32 %v699_v2, %v591_v53  ;;  %v539_v4 = vpop.f32.mrb[19].mxu0 }
 0x38b   :  { %556 = vst.msk [vmem:[%s919_s9 + $0x20] sm:$0xff] %vm551_vm2, %v537_v1  ;;  %v540_v5 = vadd.f32 %v591_v53, %v539_v4 }
 0x38c   :  { %559 = vst.msk [vmem:[%s919_s9 + $0x38] sm:$0xff] %vm551_vm2, %v548_v3 }
 0x38d   :  { %557 = vst.msk [vmem:[%s919_s9 + $0x28] sm:$0xff] %vm551_vm2, %v540_v5 }

</bundles_post_ra>
